<compile_context>
chip_gen: v6e
topology: v6e:2x2x1
jax: 0.10.0
libtpu: 0.0.40
codegen_flags: <defaults>
</compile_context>

<pallas_src>
import math

import jax
import jax.numpy as jnp
from jax.experimental import pallas as pl
from jax.experimental.pallas import tpu as pltpu


def _sig_tanh_kernel(x_ref, a_ref, b_ref, o_ref):
    # x: (tile_r, lanes); a/b: (1, lanes) -> sublane-broadcast over rows (VPU).
    x = x_ref[...].astype(jnp.float32)
    a = a_ref[...].astype(jnp.float32)
    b = b_ref[...].astype(jnp.float32)
    act_e2 = jnp.clip(b * x + 0.5, 0.0, 1.0)     # VPU min/max
    sig = jax.nn.sigmoid(x)                      # EUP transcendental (free slot)
    o_ref[...] = (a * sig + (1.0 - a) * act_e2).astype(o_ref.dtype)


def sig_tanh_pallas(x, a, b):
    """x: (..., F); a, b: (F,). Returns a*sigmoid(x) + (1-a)*clip(b*x+0.5, 0, 1)."""
    orig_shape = x.shape
    feat = orig_shape[-1]
    assert a.shape == (feat,) and b.shape == (feat,), "a/b must match last dim of x"

    if x.size == 0:  # zero-sized block would be rejected by Mosaic
        return x

    rows = math.prod(orig_shape[:-1]) if len(orig_shape) > 1 else 1

    a_f32 = a.astype(jnp.float32)
    b_f32 = b.astype(jnp.float32)

    # --- lane-dense layout: fold small feature dims into full 128-lane rows ---
    if feat < 128 and 128 % feat == 0 and (rows * feat) % 128 == 0:
        fold = 128 // feat
        lanes = 128
        rows2 = (rows * feat) // 128
        x2d = x.reshape(rows2, lanes)
        a2d = jnp.tile(a_f32, fold).reshape(1, lanes)
        b2d = jnp.tile(b_f32, fold).reshape(1, lanes)
    else:
        lanes = feat                      # full extent on the lane dim is always legal
        rows2 = rows
        x2d = x.reshape(rows2, lanes)
        a2d = a_f32.reshape(1, lanes)
        b2d = b_f32.reshape(1, lanes)

    # --- row-tile sizing: ~2 MiB per x block (same for the out block) ---
    dtype_bytes = jnp.dtype(x.dtype).itemsize
    sub = 8 * max(1, 4 // dtype_bytes)    # 8 (f32) / 16 (bf16) / 32 (int8) sublanes
    budget = 2 * 1024 * 1024
    row_bytes = max(1, lanes * dtype_bytes)
    cap = (budget // row_bytes) // sub * sub
    cap = max(sub, cap)
    if rows2 <= cap:
        tile_r = rows2                    # full-extent block: exempt from (8,128) rule
    else:
        tile_r = cap                      # multiple of `sub`; Pallas pads ragged tail

    grid = (pl.cdiv(rows2, tile_r),)

    out2d = pl.pallas_call(
        _sig_tanh_kernel,
        out_shape=jax.ShapeDtypeStruct((rows2, lanes), x.dtype),
        grid_spec=pltpu.PrefetchScalarGridSpec(
            num_scalar_prefetch=0,
            grid=grid,
            in_specs=[
                pl.BlockSpec((tile_r, lanes), lambda i: (i, 0)),   # streamed x tile
                pl.BlockSpec((1, lanes), lambda i: (0, 0)),        # resident slope a
                pl.BlockSpec((1, lanes), lambda i: (0, 0)),        # resident slope b
            ],
            out_specs=pl.BlockSpec((tile_r, lanes), lambda i: (i, 0)),
        ),
        compiler_params=pltpu.CompilerParams(
            # row axis is embarrassingly parallel -> shards across both v7x TCs,
            # neutral on single-TC v5e/v6e.
            dimension_semantics=("parallel",),
        ),
    )(x2d, a2d, b2d)

    return out2d.reshape(orig_shape)


class PActLayerSigTanh:
    """Mirror of p_act_layer_sig_tanh(layer_type='sigmoid_slope').

    a initialized to 1.0, b initialized to 0.1 (per the PyTorch module).
    forward returns (activation, [mean(a), mean(b)], [std(a), std(b)]).
    """

    def __init__(self, input_features, layer_type="sigmoid_slope"):
        self.input_features = input_features
        self.layer_type = layer_type
        self.a = jnp.full((input_features,), 1.0, dtype=jnp.float32)
        self.b = jnp.full((input_features,), 0.1, dtype=jnp.float32)

    def __call__(self, x):
        if self.layer_type == "sigmoid_slope":
            out = sig_tanh_pallas(x, self.a, self.b)
            # parameter statistics: trivial scalar reductions, plain JAX
            # (torch.std default is the unbiased estimator -> ddof=1)
            stats_mean = [jnp.mean(self.a), jnp.mean(self.b)]
            stats_std = [jnp.std(self.a, ddof=1), jnp.std(self.b, ddof=1)]
            return out, stats_mean, stats_std
        # TODO(synk): 'tanh_slope' branch (para_act_tanh) is not defined in the spec.
        raise NotImplementedError("only layer_type='sigmoid_slope' is implemented")


if __name__ == "__main__":
    key = jax.random.PRNGKey(0)
    B, S, F = 2, 8, 32                      # small shapes; last dim == input_features
    x = jax.random.normal(key, (B, S, F), dtype=jnp.float32)

    layer = PActLayerSigTanh(F)
    out, (mean_a, mean_b), (std_a, std_b) = layer(x)
    out = jax.block_until_ready(out)

    def ref_fn(x, a, b):
        act = jnp.clip(b * x + 0.5, 0.0, 1.0)
        return a * jax.nn.sigmoid(x) + (1.0 - a) * act

    # default-init check (a=1, b=0.1 -> pure sigmoid)
    ref = ref_fn(x, layer.a.reshape(1, 1, F), layer.b.reshape(1, 1, F))
    assert out.shape == x.shape and out.dtype == x.dtype
    assert jnp.allclose(out, ref, atol=1e-6, rtol=1e-6), "mismatch vs reference (default params)"

    # non-trivial a/b check (exercises the clamped linear branch + blend)
    ka, kb = jax.random.split(jax.random.PRNGKey(1))
    a2 = jax.random.uniform(ka, (F,), dtype=jnp.float32)
    b2 = 2.0 * jax.random.normal(kb, (F,), dtype=jnp.float32)
    out2 = jax.block_until_ready(sig_tanh_pallas(x, a2, b2))
    ref2 = ref_fn(x, a2.reshape(1, 1, F), b2.reshape(1, 1, F))
    assert jnp.allclose(out2, ref2, atol=1e-6, rtol=1e-6), "mismatch vs reference (random params)"

    # larger, non-folding shape (exercises the row-tiled grid path)
    x3 = jax.random.normal(jax.random.PRNGKey(2), (4096, 256), dtype=jnp.float32)
    a3 = jax.random.uniform(jax.random.PRNGKey(3), (256,), dtype=jnp.float32)
    b3 = jax.random.normal(jax.random.PRNGKey(4), (256,), dtype=jnp.float32)
    out3 = jax.block_until_ready(sig_tanh_pallas(x3, a3, b3))
    ref3 = ref_fn(x3, a3.reshape(1, 256), b3.reshape(1, 256))
    assert jnp.allclose(out3, ref3, atol=1e-6, rtol=1e-6), "mismatch vs reference (tiled path)"

    print("KERNEL_OK")
</pallas_src>

<mosaic_0001>
module attributes {stable_mosaic.version = 11 : i64} {
  func.func @_sig_tanh_kernel(%arg0: i32, %arg1: memref<4x128xf32, #tpu.memory_space<vmem>>, %arg2: memref<1x128xf32, #tpu.memory_space<vmem>>, %arg3: memref<1x128xf32, #tpu.memory_space<vmem>>, %arg4: memref<4x128xf32, #tpu.memory_space<vmem>>) attributes {dimension_semantics = [#tpu.dimension_semantics<parallel>], iteration_bounds = array<i64: 1>, scalar_prefetch = 0 : i64, scratch_operands = 0 : i64, tpu.core_type = #tpu.core_type<tc>, window_params = [{transform_indices = @transform_0, window_bounds = array<i64: 4, 128>}, {pipeline_mode = #tpu.pipeline_mode<synchronous>, transform_indices = @transform_1, window_bounds = array<i64: 1, 128>}, {pipeline_mode = #tpu.pipeline_mode<synchronous>, transform_indices = @transform_2, window_bounds = array<i64: 1, 128>}, {transform_indices = @transform_3, window_bounds = array<i64: 4, 128>}]} {
    %c0 = arith.constant 0 : index
    %c0_0 = arith.constant 0 : index
    %0 = vector.load %arg1[%c0, %c0_0] : memref<4x128xf32, #tpu.memory_space<vmem>>, vector<4x128xf32>
    %c0_1 = arith.constant 0 : index
    %c0_2 = arith.constant 0 : index
    %1 = vector.load %arg2[%c0_1, %c0_2] : memref<1x128xf32, #tpu.memory_space<vmem>>, vector<1x128xf32>
    %c0_3 = arith.constant 0 : index
    %c0_4 = arith.constant 0 : index
    %2 = vector.load %arg3[%c0_3, %c0_4] : memref<1x128xf32, #tpu.memory_space<vmem>>, vector<1x128xf32>
    %3 = vector.broadcast %2 : vector<1x128xf32> to vector<4x128xf32>
    %4 = arith.mulf %3, %0 : vector<4x128xf32>
    %cst = arith.constant 5.000000e-01 : f32
    %5 = vector.broadcast %cst : f32 to vector<4x128xf32>
    %6 = arith.addf %4, %5 : vector<4x128xf32>
    %cst_5 = arith.constant 0.000000e+00 : f32
    %cst_6 = arith.constant 1.000000e+00 : f32
    %7 = vector.broadcast %cst_5 : f32 to vector<4x128xf32>
    %8 = arith.maximumf %7, %6 : vector<4x128xf32>
    %9 = vector.broadcast %cst_6 : f32 to vector<4x128xf32>
    %10 = arith.minimumf %9, %8 : vector<4x128xf32>
    %11 = arith.negf %0 : vector<4x128xf32>
    %12 = math.exp %11 : vector<4x128xf32>
    %cst_7 = arith.constant 1.000000e+00 : f32
    %13 = vector.broadcast %cst_7 : f32 to vector<4x128xf32>
    %14 = arith.addf %13, %12 : vector<4x128xf32>
    %15 = arith.divf %13, %14 : vector<4x128xf32>
    %16 = vector.broadcast %1 : vector<1x128xf32> to vector<4x128xf32>
    %17 = arith.mulf %16, %15 : vector<4x128xf32>
    %cst_8 = arith.constant 1.000000e+00 : f32
    %18 = vector.broadcast %cst_8 : f32 to vector<1x128xf32>
    %19 = arith.subf %18, %1 : vector<1x128xf32>
    %20 = vector.broadcast %19 : vector<1x128xf32> to vector<4x128xf32>
    %21 = arith.mulf %20, %10 : vector<4x128xf32>
    %22 = arith.addf %17, %21 : vector<4x128xf32>
    %c0_9 = arith.constant 0 : index
    %c0_10 = arith.constant 0 : index
    %23 = vector.load %arg4[%c0_9, %c0_10] : memref<4x128xf32, #tpu.memory_space<vmem>>, vector<4x128xf32>
    tpu.vector_store %arg4[%c0_9, %c0_10], %22 {strides = array<i32>} : memref<4x128xf32, #tpu.memory_space<vmem>>, vector<4x128xf32>,
    return
  }
  func.func @transform_0(%arg0: i32) -> (i32, i32) {
    %c0_i32 = arith.constant 0 : i32
    %c0_i32_0 = arith.constant 0 : i32
    return %arg0, %c0_i32 : i32, i32
  }
  func.func @transform_1(%arg0: i32) -> (i32, i32) {
    %c0_i32 = arith.constant 0 : i32
    %c0_i32_0 = arith.constant 0 : i32
    %c0_i32_1 = arith.constant 0 : i32
    return %c0_i32, %c0_i32_0 : i32, i32
  }
  func.func @transform_2(%arg0: i32) -> (i32, i32) {
    %c0_i32 = arith.constant 0 : i32
    %c0_i32_0 = arith.constant 0 : i32
    %c0_i32_1 = arith.constant 0 : i32
    return %c0_i32, %c0_i32_0 : i32, i32
  }
  func.func @transform_3(%arg0: i32) -> (i32, i32) {
    %c0_i32 = arith.constant 0 : i32
    %c0_i32_0 = arith.constant 0 : i32
    return %arg0, %c0_i32 : i32, i32
  }
}

</mosaic_0001>

<bundles_post_ra>
// kernel: tpu_custom_call.1
= control target key start
LH: loop header
LB: loop body
LE: loop exit
PB: predicated region body
PF: predicated region fallthrough
CT: control target
= control target key end

     0   :  { %8 = vsyncpa [#allocation3], 0  ;;  %s164_s0 = inlined_call_operand.hbm [shape: f32[4,128], index: 0, kind: input, shape index: {}]   ;;  %s165_s1 = inlined_call_operand.vmem [shape: f32[1,128], index: 1, kind: input, shape index: {}]   ;;  %s166_s2 = inlined_call_operand.vmem [shape: f32[1,128], index: 2, kind: input, shape index: {}]   ;;  %s167_s3 = inlined_call_operand.hbm [shape: f32[4,128], index: 3, kind: output, shape index: {}]  }
   0x1   :  { %9 = vsyncpa [#allocation4], 0  ;;  %s130_s12 = smov [#allocation2]  }
   0x2   :  { %s16_s13 = sshll.u32 %s130_s12, 4  ;;  %s17_s13 = int_to_ptr.vmem [resolvable:$true] %s16_s13 }
   0x3   :  { %s94_s14 = scalar_lea.vmem %s17_s13, 64  ;;  %p99_p1 = scmp.lt.s32.totalorder %s17_s13, %s17_s13 }
   0x4   :  { %p95_p0 = scmp.ne.s32.totalorder %s17_s13, %s94_s14  ;;  %p100_p2 = scmp.lt.s32.totalorder %s94_s14, %s94_s14 }
   0x6   :  { %p101_p3 = por %p100_p2, %p99_p1 }
   0x8   :  { %p102_p4 = pnand %p101_p3, %p95_p0 }
   0xa   :  { %105 = shalt.err (!%p102_p4)
}
   0xb   :  { %19 = dma.hbm_to_vmem [thread:$0]  %s164_s0, 64, %s17_s13, [#allocation3]  }
   0xc   :  { %126 = dma.done.wait [#allocation3], 64  }
   0xd   :  { %127 = vsyncadd [#allocation3], 4294967232  ;;  %v27_v0 = vld [vmem:[#allocation2] sm:$0xf]  ;;  %v47_v4 = vlaneseq  ;;  %s131_s0 = smov [#allocation5]  }
   0xe   :  { %v79_v1 = vmul.f32 -1.442695, %v27_v0  ;;  %v78_v2 = vld [vmem:[%s166_s2] ss:$0 sm:$0xff]  ;;  %s69_s2 = sshll.u32 %s131_s0, 4  ;;  %s70_s2 = int_to_ptr.vmem [resolvable:$true] %s69_s2 }
   0xf   :  { %v36_v3 = vmul.f32 %v78_v2, %v27_v0  ;;  %v48_v8 = vshrl.u32 %v47_v4, 7  ;;  %v28_v9 = vld [vmem:[%s165_s1] sm:$0x1]  ;;  %s106_s21 = scalar_lea.vmem %s70_s2, 64  ;;  %p111_p6 = scmp.lt.s32.totalorder %s70_s2, %s70_s2 }
  0x10   :  { %82 = vpow2.f32 %v79_v1  ;;  %v53_v12 = vsub.f32 1.0, %v28_v9  ;;  %p107_p5 = scmp.ne.s32.totalorder %s70_s2, %s106_s21  ;;  %p112_p7 = scmp.lt.s32.totalorder %s106_s21, %s106_s21 }
  0x11   :  { %v37_v7 = vadd.f32 0.5, %v36_v3  ;;  %v49_v11 = vsub.s32 0, %v48_v8 }
  0x12   :  { %p113_p8 = por %p112_p7, %p111_p6 }
  0x13   :  { %v38_v10 = vmax.f32 %v37_v7, 0.0  ;;  %v58_v14 = vrot.slane %v53_v12, %v49_v11  ;;  %v50_v15 = vrot.slane %v28_v9, %v49_v11 }
  0x14   :  { %p114_p9 = pnand %p113_p8, %p107_p5 }
  0x15   :  { %v39_v13 = vmin.f32 %v38_v10, 1.0 }
  0x17   :  { %v60_v16 = vmul.f32 %v58_v14, %v39_v13 }
  0x1d   :  { %v83_v5 = vpop.eup %82 }
  0x1e   :  { %v43_v6 = vadd.f32 1.0, %v83_v5 }
  0x20   :  { %84 = vrcp.f32 %v43_v6 }
  0x2d   :  { %v85_v17 = vpop.eup %84 }
  0x2e   :  { %v52_v18 = vmul.f32 %v85_v17, %v50_v15 }
  0x30   :  { %v61_v19 = vadd.f32 %v60_v16, %v52_v18 }
  0x32   :  { %62 = vst [vmem:[#allocation5] sm:$0xf] %v61_v19 }
  0x33   :  { %117 = shalt.err (!%p114_p9)
}
  0x34   :  { %72 = dma.vmem_to_hbm [thread:$0]  %s70_s2, 64, %s167_s3, [#allocation4]  }
  0x35   :  { %128 = dma.done.wait [#allocation4], 64  }
  0x36   :  { %129 = vsyncadd [#allocation4], 4294967232 }
  0x37   :  { %76 = vsyncpa [#allocation3], 1 }
  0x38   :  { %77 = vsyncpa [#allocation4], 1 }

</bundles_post_ra>
